<compile_context>
chip_gen: v7x
topology: tpu7x:2x2x1
jax: 0.10.0
libtpu: 0.0.40
codegen_flags: <defaults>
</compile_context>

<pallas_src>
import jax
import jax.numpy as jnp
from jax.experimental import pallas as pl
from jax.experimental.pallas import tpu as pltpu


def _elu_pair(x):
    """Return (elu(x), elu(-x)) using a single exp per element (f32)."""
    e = jnp.exp(-jnp.abs(x)) - 1.0
    pos = x > 0.0
    return jnp.where(pos, x, e), jnp.where(pos, e, -x)


def _gated_resnet_kernel(og_ref, a_ref, w1_ref, b1_ref, w2_ref, hb_ref,
                         out_ref):
    # og/a tiles: (1, C, T) with pixels T on the lane axis.
    og = og_ref[0].astype(jnp.float32)          # (C, T)
    av = a_ref[0].astype(jnp.float32)           # (C, T)
    C = og.shape[0]
    dt = w1_ref.dtype                           # dot operand dtype (bf16/f32)

    # concat_elu of og_x and a (single exp + selects per element).
    up_og, un_og = _elu_pair(og)
    up_a, un_a = _elu_pair(av)

    # Fused conv_input + nin_skip as partial-sum dots (no (4C,T) concat buffer):
    #   x1 = W_in[:, :C]@elu(og) + W_in[:, C:]@elu(-og)
    #      + W_skip[:, :C]@elu(a) + W_skip[:, C:]@elu(-a) + (b_in + b_skip)
    x1 = jnp.dot(w1_ref[0], up_og.astype(dt), preferred_element_type=jnp.float32)
    x1 = x1 + jnp.dot(w1_ref[1], un_og.astype(dt), preferred_element_type=jnp.float32)
    x1 = x1 + jnp.dot(w1_ref[2], up_a.astype(dt), preferred_element_type=jnp.float32)
    x1 = x1 + jnp.dot(w1_ref[3], un_a.astype(dt), preferred_element_type=jnp.float32)
    x1 = x1 + b1_ref[...]                       # (C, T)

    # concat_elu -> (Dropout2d identity in eval) -> conv_out (2C -> 2C),
    # plus per-batch bias hb = h @ hw + b_out (resident in VMEM, one row/batch).
    up1, un1 = _elu_pair(x1)
    hbv = hb_ref[pl.program_id(0)]              # (2C, 1), f32
    x2 = jnp.dot(w2_ref[0], up1.astype(dt), preferred_element_type=jnp.float32)
    x2 = x2 + jnp.dot(w2_ref[1], un1.astype(dt), preferred_element_type=jnp.float32)
    x2 = x2 + hbv                               # (2C, T)

    a_half = x2[:C, :]
    b_half = x2[C:, :]
    # sigmoid(x) = 0.5*(tanh(x/2)+1): one EUP op instead of exp + reciprocal.
    gate = 0.5 * jnp.tanh(0.5 * b_half) + 0.5
    out_ref[0] = (og + a_half * gate).astype(out_ref.dtype)


def _pick_tile(hw, want):
    """Largest lane tile <= want that divides HW (multiple of 128), else HW."""
    if hw <= want:
        return hw
    t = (want // 128) * 128
    while t >= 128:
        if hw % t == 0:
            return t
        t -= 128
    # TODO(synk): pad/mask the pixel axis for HW with no 128-multiple divisor.
    return hw


def gated_resnet_pallas(og_x, a, h, params, *, tile_pixels=4096,
                        dot_dtype=jnp.bfloat16):
    """og_x, a: NCHW [B, C, H, W]; h: [B, h_dim]. Returns NCHW [B, C, H, W].

    params (PyTorch Linear layout, effective weight-norm weights):
      w_in   (C, 2C),  b_in   (C,)
      w_skip (C, 2C),  b_skip (C,)
      w_out  (2C, 2C), b_out  (2C,)
      hw     (h_dim, 2C)
    """
    B, C, H, W = og_x.shape
    HW = H * W
    tile = _pick_tile(HW, tile_pixels)

    # No transposes: NCHW -> (B, C, HW), channels on sublanes / pixels on lanes.
    og_rows = og_x.reshape(B, C, HW)
    a_rows = a.reshape(B, C, HW)

    # Weight chunks (prepared once in the wrapper, resident across the grid).
    w_in, w_skip, w_out = params["w_in"], params["w_skip"], params["w_out"]
    w1 = jnp.stack([w_in[:, :C], w_in[:, C:],
                    w_skip[:, :C], w_skip[:, C:]], axis=0).astype(dot_dtype)   # (4, C, C)
    b1 = (params["b_in"] + params["b_skip"]).reshape(C, 1).astype(jnp.float32)  # (C, 1)
    w2 = jnp.stack([w_out[:, :C], w_out[:, C:]], axis=0).astype(dot_dtype)      # (2, 2C, C)
    hb = (h.astype(jnp.float32) @ params["hw"].astype(jnp.float32)
          + params["b_out"][None, :].astype(jnp.float32)).reshape(B, 2 * C, 1)  # (B, 2C, 1)

    # Grid: batch x pixel tiles. Both axes independent -> "parallel" so v7x's
    # two TensorCores can split the (>= 2-step) grid.
    grid = (B, HW // tile)
    row_spec = pl.BlockSpec((1, C, tile), lambda b, p: (b, 0, p))

    out_rows = pl.pallas_call(
        _gated_resnet_kernel,
        out_shape=jax.ShapeDtypeStruct((B, C, HW), og_x.dtype),
        grid_spec=pltpu.PrefetchScalarGridSpec(
            num_scalar_prefetch=0,
            grid=grid,
            in_specs=[
                row_spec,                                                # og_x
                row_spec,                                                # a
                pl.BlockSpec((4, C, C), lambda b, p: (0, 0, 0)),         # W_in/W_skip chunks
                pl.BlockSpec((C, 1), lambda b, p: (0, 0)),               # b_in + b_skip
                pl.BlockSpec((2, 2 * C, C), lambda b, p: (0, 0, 0)),     # W_out chunks
                pl.BlockSpec((B, 2 * C, 1), lambda b, p: (0, 0, 0)),     # h@hw + b_out (all batches)
            ],
            out_specs=row_spec,
        ),
        compiler_params=pltpu.CompilerParams(
            dimension_semantics=("parallel", "parallel")),
    )(og_rows, a_rows, w1, b1, w2, hb)

    return out_rows.reshape(B, C, H, W)


# ---------------- pure-JAX reference for validation ----------------
def _concat_elu_ref(x):  # channels-last
    return jax.nn.elu(jnp.concatenate([x, -x], axis=-1))


def gated_resnet_ref(og_x, a, h, params):
    og = jnp.transpose(og_x, (0, 2, 3, 1))            # NHWC
    av = jnp.transpose(a, (0, 2, 3, 1))
    x = _concat_elu_ref(og) @ params["w_in"].T + params["b_in"]
    x = x + _concat_elu_ref(av) @ params["w_skip"].T + params["b_skip"]
    x = _concat_elu_ref(x)
    x = x @ params["w_out"].T + params["b_out"]       # (..., 2C)
    hproj = h @ params["hw"]                          # (B, 2C)
    x = x + hproj[:, None, None, :]
    a_half, b_half = jnp.split(x, 2, axis=-1)
    out = og + a_half * jax.nn.sigmoid(b_half)
    return jnp.transpose(out, (0, 3, 1, 2))


if __name__ == "__main__":
    B, C, H, W = 2, 32, 16, 16      # num_filters = 32
    h_dim = 128

    key = jax.random.PRNGKey(0)
    ks = jax.random.split(key, 10)

    og_x = jax.random.normal(ks[0], (B, C, H, W), jnp.float32)
    a_in = jax.random.normal(ks[1], (B, C, H, W), jnp.float32)
    h_in = jax.random.normal(ks[2], (B, h_dim), jnp.float32)

    # Deterministic effective weights (PyTorch Linear layout: (out, in)).
    params = {
        "w_in":   0.05 * jax.random.normal(ks[3], (C, 2 * C), jnp.float32),
        "b_in":   0.05 * jax.random.normal(ks[4], (C,), jnp.float32),
        "w_skip": 0.05 * jax.random.normal(ks[5], (C, 2 * C), jnp.float32),
        "b_skip": 0.05 * jax.random.normal(ks[6], (C,), jnp.float32),
        "w_out":  0.05 * jax.random.normal(ks[7], (2 * C, 2 * C), jnp.float32),
        "b_out":  0.05 * jax.random.normal(ks[8], (2 * C,), jnp.float32),
        "hw":     0.05 * jax.random.normal(ks[9], (h_dim, 2 * C), jnp.float32),
    }

    ref = jax.block_until_ready(gated_resnet_ref(og_x, a_in, h_in, params))

    # Tight check with f32 dots (exact-semantics path).
    out_f32 = jax.block_until_ready(
        gated_resnet_pallas(og_x, a_in, h_in, params, dot_dtype=jnp.float32))
    assert out_f32.shape == (B, C, H, W)
    assert jnp.allclose(out_f32, ref, atol=1e-4, rtol=1e-4), float(
        jnp.max(jnp.abs(out_f32 - ref)))

    # Default (bf16-dot) path: same structure, looser tolerance for bf16
    # operand rounding with f32 accumulation.
    out_bf = jax.block_until_ready(
        gated_resnet_pallas(og_x, a_in, h_in, params))
    assert jnp.allclose(out_bf, ref, atol=5e-2, rtol=5e-2), float(
        jnp.max(jnp.abs(out_bf - ref)))

    print("KERNEL_OK")
</pallas_src>

<mosaic_0001>
module attributes {stable_mosaic.version = 11 : i64} {
  func.func @_gated_resnet_kernel(%arg0: i32, %arg1: i32, %arg2: memref<1x32x256xf32, #tpu.memory_space<vmem>>, %arg3: memref<1x32x256xf32, #tpu.memory_space<vmem>>, %arg4: memref<4x32x32xf32, #tpu.memory_space<vmem>>, %arg5: memref<32x1xf32, #tpu.memory_space<vmem>>, %arg6: memref<2x64x32xf32, #tpu.memory_space<vmem>>, %arg7: memref<2x64x1xf32, #tpu.memory_space<vmem>>, %arg8: memref<1x32x256xf32, #tpu.memory_space<vmem>>) attributes {dimension_semantics = [#tpu.dimension_semantics<parallel>, #tpu.dimension_semantics<parallel>], iteration_bounds = array<i64: 2, 1>, scalar_prefetch = 0 : i64, scratch_operands = 0 : i64, tpu.core_type = #tpu.core_type<tc>, window_params = [{transform_indices = @transform_0, window_bounds = array<i64: 1, 32, 256>}, {transform_indices = @transform_1, window_bounds = array<i64: 1, 32, 256>}, {pipeline_mode = #tpu.pipeline_mode<synchronous>, transform_indices = @transform_2, window_bounds = array<i64: 4, 32, 32>}, {pipeline_mode = #tpu.pipeline_mode<synchronous>, transform_indices = @transform_3, window_bounds = array<i64: 32, 1>}, {pipeline_mode = #tpu.pipeline_mode<synchronous>, transform_indices = @transform_4, window_bounds = array<i64: 2, 64, 32>}, {pipeline_mode = #tpu.pipeline_mode<synchronous>, transform_indices = @transform_5, window_bounds = array<i64: 2, 64, 1>}, {transform_indices = @transform_6, window_bounds = array<i64: 1, 32, 256>}]} {
    %c0 = arith.constant 0 : index
    %c0_0 = arith.constant 0 : index
    %c0_1 = arith.constant 0 : index
    %0 = vector.load %arg2[%c0, %c0_0, %c0_1] : memref<1x32x256xf32, #tpu.memory_space<vmem>>, vector<1x32x256xf32>
    %1 = vector.shape_cast %0 : vector<1x32x256xf32> to vector<32x256xf32>
    %c0_2 = arith.constant 0 : index
    %c0_3 = arith.constant 0 : index
    %c0_4 = arith.constant 0 : index
    %2 = vector.load %arg3[%c0_2, %c0_3, %c0_4] : memref<1x32x256xf32, #tpu.memory_space<vmem>>, vector<1x32x256xf32>
    %3 = vector.shape_cast %2 : vector<1x32x256xf32> to vector<32x256xf32>
    %4 = math.absf %1 : vector<32x256xf32>
    %cst = arith.constant 0.000000e+00 : f32
    %5 = vector.broadcast %cst : f32 to vector<32x256xf32>
    %6 = arith.subf %5, %4 : vector<32x256xf32>
    %7 = math.exp %6 : vector<32x256xf32>
    %cst_5 = arith.constant 1.000000e+00 : f32
    %8 = vector.broadcast %cst_5 : f32 to vector<32x256xf32>
    %9 = arith.subf %7, %8 : vector<32x256xf32>
    %cst_6 = arith.constant 0.000000e+00 : f32
    %10 = vector.broadcast %cst_6 : f32 to vector<32x256xf32>
    %11 = arith.cmpf ogt, %1, %10 : vector<32x256xf32>
    %12 = arith.select %11, %1, %9 : vector<32x256xi1>, vector<32x256xf32>
    %cst_7 = arith.constant 0.000000e+00 : f32
    %13 = vector.broadcast %cst_7 : f32 to vector<32x256xf32>
    %14 = arith.subf %13, %1 : vector<32x256xf32>
    %15 = arith.select %11, %9, %14 : vector<32x256xi1>, vector<32x256xf32>
    %16 = math.absf %3 : vector<32x256xf32>
    %cst_8 = arith.constant 0.000000e+00 : f32
    %17 = vector.broadcast %cst_8 : f32 to vector<32x256xf32>
    %18 = arith.subf %17, %16 : vector<32x256xf32>
    %19 = math.exp %18 : vector<32x256xf32>
    %cst_9 = arith.constant 1.000000e+00 : f32
    %20 = vector.broadcast %cst_9 : f32 to vector<32x256xf32>
    %21 = arith.subf %19, %20 : vector<32x256xf32>
    %cst_10 = arith.constant 0.000000e+00 : f32
    %22 = vector.broadcast %cst_10 : f32 to vector<32x256xf32>
    %23 = arith.cmpf ogt, %3, %22 : vector<32x256xf32>
    %24 = arith.select %23, %3, %21 : vector<32x256xi1>, vector<32x256xf32>
    %cst_11 = arith.constant 0.000000e+00 : f32
    %25 = vector.broadcast %cst_11 : f32 to vector<32x256xf32>
    %26 = arith.subf %25, %3 : vector<32x256xf32>
    %27 = arith.select %23, %21, %26 : vector<32x256xi1>, vector<32x256xf32>
    %c0_12 = arith.constant 0 : index
    %c0_13 = arith.constant 0 : index
    %c0_14 = arith.constant 0 : index
    %28 = vector.load %arg4[%c0_12, %c0_13, %c0_14] : memref<4x32x32xf32, #tpu.memory_space<vmem>>, vector<1x32x32xf32>
    %29 = vector.shape_cast %28 : vector<1x32x32xf32> to vector<32x32xf32>
    %cst_15 = arith.constant dense<0.000000e+00> : vector<32x256xf32>
    %30 = tpu.matmul %29, %12, %cst_15 {dimension_numbers = #tpu.dot_dimension_numbers<[1], [0], [0], [1], [0, 0, 1, 1], [], []>} : vector<32x32xf32>, vector<32x256xf32>, vector<32x256xf32> -> vector<32x256xf32>
    %c1 = arith.constant 1 : index
    %c0_16 = arith.constant 0 : index
    %c0_17 = arith.constant 0 : index
    %31 = vector.load %arg4[%c1, %c0_16, %c0_17] : memref<4x32x32xf32, #tpu.memory_space<vmem>>, vector<1x32x32xf32>
    %32 = vector.shape_cast %31 : vector<1x32x32xf32> to vector<32x32xf32>
    %cst_18 = arith.constant dense<0.000000e+00> : vector<32x256xf32>
    %33 = tpu.matmul %32, %15, %cst_18 {dimension_numbers = #tpu.dot_dimension_numbers<[1], [0], [0], [1], [0, 0, 1, 1], [], []>} : vector<32x32xf32>, vector<32x256xf32>, vector<32x256xf32> -> vector<32x256xf32>
    %34 = arith.addf %30, %33 : vector<32x256xf32>
    %c2 = arith.constant 2 : index
    %c0_19 = arith.constant 0 : index
    %c0_20 = arith.constant 0 : index
    %35 = vector.load %arg4[%c2, %c0_19, %c0_20] : memref<4x32x32xf32, #tpu.memory_space<vmem>>, vector<1x32x32xf32>
    %36 = vector.shape_cast %35 : vector<1x32x32xf32> to vector<32x32xf32>
    %cst_21 = arith.constant dense<0.000000e+00> : vector<32x256xf32>
    %37 = tpu.matmul %36, %24, %cst_21 {dimension_numbers = #tpu.dot_dimension_numbers<[1], [0], [0], [1], [0, 0, 1, 1], [], []>} : vector<32x32xf32>, vector<32x256xf32>, vector<32x256xf32> -> vector<32x256xf32>
    %38 = arith.addf %34, %37 : vector<32x256xf32>
    %c3 = arith.constant 3 : index
    %c0_22 = arith.constant 0 : index
    %c0_23 = arith.constant 0 : index
    %39 = vector.load %arg4[%c3, %c0_22, %c0_23] : memref<4x32x32xf32, #tpu.memory_space<vmem>>, vector<1x32x32xf32>
    %40 = vector.shape_cast %39 : vector<1x32x32xf32> to vector<32x32xf32>
    %cst_24 = arith.constant dense<0.000000e+00> : vector<32x256xf32>
    %41 = tpu.matmul %40, %27, %cst_24 {dimension_numbers = #tpu.dot_dimension_numbers<[1], [0], [0], [1], [0, 0, 1, 1], [], []>} : vector<32x32xf32>, vector<32x256xf32>, vector<32x256xf32> -> vector<32x256xf32>
    %42 = arith.addf %38, %41 : vector<32x256xf32>
    %c0_25 = arith.constant 0 : index
    %c0_26 = arith.constant 0 : index
    %43 = vector.load %arg5[%c0_25, %c0_26] : memref<32x1xf32, #tpu.memory_space<vmem>>, vector<32x1xf32>
    %44 = vector.broadcast %43 : vector<32x1xf32> to vector<32x256xf32>
    %45 = arith.addf %42, %44 : vector<32x256xf32>
    %46 = math.absf %45 : vector<32x256xf32>
    %cst_27 = arith.constant 0.000000e+00 : f32
    %47 = vector.broadcast %cst_27 : f32 to vector<32x256xf32>
    %48 = arith.subf %47, %46 : vector<32x256xf32>
    %49 = math.exp %48 : vector<32x256xf32>
    %cst_28 = arith.constant 1.000000e+00 : f32
    %50 = vector.broadcast %cst_28 : f32 to vector<32x256xf32>
    %51 = arith.subf %49, %50 : vector<32x256xf32>
    %cst_29 = arith.constant 0.000000e+00 : f32
    %52 = vector.broadcast %cst_29 : f32 to vector<32x256xf32>
    %53 = arith.cmpf ogt, %45, %52 : vector<32x256xf32>
    %54 = arith.select %53, %45, %51 : vector<32x256xi1>, vector<32x256xf32>
    %cst_30 = arith.constant 0.000000e+00 : f32
    %55 = vector.broadcast %cst_30 : f32 to vector<32x256xf32>
    %56 = arith.subf %55, %45 : vector<32x256xf32>
    %57 = arith.select %53, %51, %56 : vector<32x256xi1>, vector<32x256xf32>
    %58 = arith.index_cast %arg0 : i32 to index
    %c0_31 = arith.constant 0 : index
    %c0_32 = arith.constant 0 : index
    %59 = vector.load %arg7[%58, %c0_31, %c0_32] : memref<2x64x1xf32, #tpu.memory_space<vmem>>, vector<1x64x1xf32>
    %60 = vector.shape_cast %59 : vector<1x64x1xf32> to vector<64x1xf32>
    %c0_33 = arith.constant 0 : index
    %c0_34 = arith.constant 0 : index
    %c0_35 = arith.constant 0 : index
    %61 = vector.load %arg6[%c0_33, %c0_34, %c0_35] : memref<2x64x32xf32, #tpu.memory_space<vmem>>, vector<1x64x32xf32>
    %62 = vector.shape_cast %61 : vector<1x64x32xf32> to vector<64x32xf32>
    %cst_36 = arith.constant dense<0.000000e+00> : vector<64x256xf32>
    %63 = tpu.matmul %62, %54, %cst_36 {dimension_numbers = #tpu.dot_dimension_numbers<[1], [0], [0], [1], [0, 0, 1, 1], [], []>} : vector<64x32xf32>, vector<32x256xf32>, vector<64x256xf32> -> vector<64x256xf32>
    %c1_37 = arith.constant 1 : index
    %c0_38 = arith.constant 0 : index
    %c0_39 = arith.constant 0 : index
    %64 = vector.load %arg6[%c1_37, %c0_38, %c0_39] : memref<2x64x32xf32, #tpu.memory_space<vmem>>, vector<1x64x32xf32>
    %65 = vector.shape_cast %64 : vector<1x64x32xf32> to vector<64x32xf32>
    %cst_40 = arith.constant dense<0.000000e+00> : vector<64x256xf32>
    %66 = tpu.matmul %65, %57, %cst_40 {dimension_numbers = #tpu.dot_dimension_numbers<[1], [0], [0], [1], [0, 0, 1, 1], [], []>} : vector<64x32xf32>, vector<32x256xf32>, vector<64x256xf32> -> vector<64x256xf32>
    %67 = arith.addf %63, %66 : vector<64x256xf32>
    %68 = vector.broadcast %60 : vector<64x1xf32> to vector<64x256xf32>
    %69 = arith.addf %67, %68 : vector<64x256xf32>
    %70 = vector.extract_strided_slice %69 {offsets = [0, 0], sizes = [32, 256], strides = [1, 1]} : vector<64x256xf32> to vector<32x256xf32>
    %71 = vector.extract_strided_slice %69 {offsets = [32, 0], sizes = [32, 256], strides = [1, 1]} : vector<64x256xf32> to vector<32x256xf32>
    %cst_41 = arith.constant 5.000000e-01 : f32
    %72 = vector.broadcast %cst_41 : f32 to vector<32x256xf32>
    %73 = arith.mulf %72, %71 : vector<32x256xf32>
    %74 = math.tanh %73 : vector<32x256xf32>
    %cst_42 = arith.constant 5.000000e-01 : f32
    %75 = vector.broadcast %cst_42 : f32 to vector<32x256xf32>
    %76 = arith.mulf %75, %74 : vector<32x256xf32>
    %cst_43 = arith.constant 5.000000e-01 : f32
    %77 = vector.broadcast %cst_43 : f32 to vector<32x256xf32>
    %78 = arith.addf %76, %77 : vector<32x256xf32>
    %79 = arith.mulf %70, %78 : vector<32x256xf32>
    %80 = arith.addf %1, %79 : vector<32x256xf32>
    %c0_44 = arith.constant 0 : index
    %c0_45 = arith.constant 0 : index
    %c0_46 = arith.constant 0 : index
    %81 = vector.load %arg8[%c0_44, %c0_45, %c0_46] : memref<1x32x256xf32, #tpu.memory_space<vmem>>, vector<1x32x256xf32>
    %82 = vector.shape_cast %81 : vector<1x32x256xf32> to vector<32x256xf32>
    %83 = vector.shape_cast %80 : vector<32x256xf32> to vector<1x32x256xf32>
    tpu.vector_store %arg8[%c0_44, %c0_45, %c0_46], %83 {strides = array<i32>} : memref<1x32x256xf32, #tpu.memory_space<vmem>>, vector<1x32x256xf32>,
    return
  }
  func.func @transform_0(%arg0: i32, %arg1: i32) -> (i32, i32, i32) {
    %c0_i32 = arith.constant 0 : i32
    %c0_i32_0 = arith.constant 0 : i32
    return %arg0, %c0_i32, %arg1 : i32, i32, i32
  }
  func.func @transform_1(%arg0: i32, %arg1: i32) -> (i32, i32, i32) {
    %c0_i32 = arith.constant 0 : i32
    %c0_i32_0 = arith.constant 0 : i32
    return %arg0, %c0_i32, %arg1 : i32, i32, i32
  }
  func.func @transform_2(%arg0: i32, %arg1: i32) -> (i32, i32, i32) {
    %c0_i32 = arith.constant 0 : i32
    %c0_i32_0 = arith.constant 0 : i32
    %c0_i32_1 = arith.constant 0 : i32
    %c0_i32_2 = arith.constant 0 : i32
    return %c0_i32, %c0_i32_0, %c0_i32_1 : i32, i32, i32
  }
  func.func @transform_3(%arg0: i32, %arg1: i32) -> (i32, i32) {
    %c0_i32 = arith.constant 0 : i32
    %c0_i32_0 = arith.constant 0 : i32
    %c0_i32_1 = arith.constant 0 : i32
    return %c0_i32, %c0_i32_0 : i32, i32
  }
  func.func @transform_4(%arg0: i32, %arg1: i32) -> (i32, i32, i32) {
    %c0_i32 = arith.constant 0 : i32
    %c0_i32_0 = arith.constant 0 : i32
    %c0_i32_1 = arith.constant 0 : i32
    %c0_i32_2 = arith.constant 0 : i32
    return %c0_i32, %c0_i32_0, %c0_i32_1 : i32, i32, i32
  }
  func.func @transform_5(%arg0: i32, %arg1: i32) -> (i32, i32, i32) {
    %c0_i32 = arith.constant 0 : i32
    %c0_i32_0 = arith.constant 0 : i32
    %c0_i32_1 = arith.constant 0 : i32
    %c0_i32_2 = arith.constant 0 : i32
    return %c0_i32, %c0_i32_0, %c0_i32_1 : i32, i32, i32
  }
  func.func @transform_6(%arg0: i32, %arg1: i32) -> (i32, i32, i32) {
    %c0_i32 = arith.constant 0 : i32
    %c0_i32_0 = arith.constant 0 : i32
    return %arg0, %c0_i32, %arg1 : i32, i32, i32
  }
}

</mosaic_0001>

<bundles_post_ra>
// kernel: tpu_custom_call.1
= control target key start
LH: loop header
LB: loop body
LE: loop exit
PB: predicated region body
PF: predicated region fallthrough
CT: control target
= control target key end

     0   :  { %11 = vsyncpa [#allocation3], 0  ;;  %s2628_s0 = inlined_call_operand.vmem [shape: f32[2,32,256], index: 0, kind: input, shape index: {}]   ;;  %s2629_s1 = inlined_call_operand.vmem [shape: f32[2,32,256], index: 1, kind: input, shape index: {}]   ;;  %s2630_s2 = inlined_call_operand.hbm [shape: f32[4,32,32], index: 2, kind: input, shape index: {}]   ;;  %s2631_s3 = inlined_call_operand.vmem [shape: f32[32,1], index: 3, kind: input, shape index: {}]   ;;  %s2632_s4 = inlined_call_operand.vmem [shape: f32[2,64,32], index: 4, kind: input, shape index: {}]   ;;  %s2633_s5 = inlined_call_operand.vmem [shape: f32[2,64,1], index: 5, kind: input, shape index: {}]   ;;  %s2634_s6 = inlined_call_operand.hbm [shape: f32[2,32,256], index: 6, kind: output, shape index: {}]  }
   0x1   :  { %12 = vsyncpa [#allocation4], 0 }
   0x2   :  { %14 = vsyncpa [#allocation4 + $0x1], 0  ;;  %s2049_s21 = smov 0   ;;  %s2051_s22 = smov 0  }
   0x3   :  { %s2053_s23 = smov 0   ;;  %s2055_s24 = smov 0  }
   0x4   :  { %s2057_s25 = smov 0   ;;  %s2059_s26 = smov 0  }
   0x5 LB: > { %s1576_s27 = sadd.s32 4294967295, %s2004_s26   ;;  %s1577_s28 = sadd.s32 4294967294, %s2004_s26   ;;  %s2004_s26 = sphi %s2059_s26, %s20_s26   ;;  %s2000_s25 = sphi %s2057_s25, %s2652_s25   ;;  %s1996_s24 = sphi %s2055_s24, %s2651_s24   ;;  %s1992_s23 = sphi %s2053_s23, %s2650_s23   ;;  %s1988_s22 = sphi %s2051_s22, %s2649_s22   ;;  %s1984_s21 = sphi %s2049_s21, %s2648_s21  }
   0x6   : > { %s32_s29 = sadd.s32 1, %s2000_s25  ;;  %s181_s30 = sadd.s32 1, %s1992_s23 }
   0x7   : > { %p34_p0 = scmp.ge.s32.totalorder %s32_s29, 2  ;;  %p191_p1 = scmp.ne.s32.totalorder %s1992_s23, %s1988_s22 }
   0x8   : > { %p192_p2 = scmp.eq.s32.totalorder %s1576_s27, 1  ;;  %p197_p3 = scmp.ne.s32.totalorder %s1988_s22, %s1984_s21 }
   0x9   : > { %s2654_s29 = smov (%p34_p0, %s32_s29), 0  ;;  %p198_p5 = scmp.eq.s32.totalorder %s1577_s28, 1 }
   0xa   : > { %p2089_p4 = por %p192_p2, %p191_p1  ;;  %s176_s8 = ssub.s32 %s2000_s25, %s2654_s29 }
   0xb   : > { %p1578_p6 = scmp.ge.s32.totalorder %s2004_s26, 1  ;;  %p179_p7 = scmp.eq.s32.totalorder %s176_s8, 0 }
   0xc   : > { %s2639_s7 = scalar_select %p2089_p4, 1, 0 }
   0xd   : > { %p2096_p8 = por %p198_p5, %p197_p3  ;;  %p205_p9 = scmp.lt.s32.totalorder %s2004_s26, 3 }
   0xe   : > { %s2102_s10 = scalar_select %p179_p7, %s1992_s23, %s181_s30  }
   0xf   : > { %s2640_s9 = scalar_select %p2096_p8, 1, 0 }
  0x10   : > { %p2104_p10 = pnand %p1578_p6, %p205_p9  ;;  %p2108_p11 = scmp.eq.s32.totalorder %s1576_s27, 0 }
  0x11   : > { %s2006_s13 = smov [#allocation2]   ;;  %s1894_s18 = scalar_lea.hbm %s2630_s2, 2048 }
  0x12   : > { %s2641_s11 = scalar_select %p2104_p10, 1, 0 }
  0x13   : > { %s2642_s12 = scalar_select %p2108_p11, 1, 0 }
  0x14   : > { %p1755_p12 = pneg %p2104_p10  ;;  %s217_s14 = sshll.u32 %s2006_s13, 4  ;;  %s218_s14 = int_to_ptr.vmem [resolvable:$true] %s217_s14 }
  0x15   : > { %p1895_p0 = scmp.ne.s32.totalorder %s2630_s2, %s1894_s18  ;;  %p1901_p5 = scmp.lt.u32.totalorder %s1894_s18, %s2630_s2 }
  0x16   : > { %p2116_p13 = pnand %p2108_p11, %p1755_p12 }
  0x18   : > { %p1896_p1 = pneg %p2116_p13 }
  0x1a   : > { %p1897_p2 = pnand %p1896_p1, %p1895_p0 }
  0x1c   : > { %p1898_p3 = pneg %p1897_p2 }
  0x1e   : > { %p1903_p6 = pnand %p1901_p5, %p1898_p3 }
  0x20   : > { %1906 = shalt.err (!%p1903_p6)
}
  0x21   : > { %s1907_s30 = scalar_lea.vmem %s218_s14, 2048  ;;  %p1915_p8 = scmp.lt.s32.totalorder %s218_s14, %s218_s14 }
  0x22   : > { %p1908_p7 = scmp.ne.s32.totalorder %s218_s14, %s1907_s30  ;;  %p1916_p4 = scmp.lt.s32.totalorder %s1907_s30, %s1907_s30 }
  0x24   : > { %p1910_p9 = pnand %p1908_p7, %p1896_p1  ;;  %p1917_p11 = por %p1916_p4, %p1915_p8 }
  0x26   : > { %p1911_p12 = pneg %p1910_p9 }
  0x28   : > { %p1918_p10 = pnand %p1917_p11, %p1911_p12 }
  0x2a   : > { %1921 = shalt.err (!%p1918_p10)
}
  0x2b   : > { %s2007_s8 = smov 128   ;;  %s2008_s13 = smov 8  }
  0x2c   : > { %1758 = dma.hbm_to_vmem [thread:$0]  (!%p2116_p13), %s2630_s2, 2048, %s218_s14, [#allocation3], %s2007_s8, %s2007_s8, %s2008_s13  }
  0x2d   : > { %p2644_p0 = scmp.ne.s32.totalorder %s2641_s11, 0 }
  0x2e   : > { %p2645_p2 = scmp.ne.s32.totalorder (!%p2644_p0), %s2642_s12, 0 }
  0x2f   : > { %268 = sbr.rel (%p2644_p0) target bundleno = 706 (0x2c2), region = 44 }
  0x36   : > { %1975 = dma.done.wait (%p2645_p2), [#allocation3], 2048  }
  0x37   : > { %1977 = vsyncadd (%p2645_p2), [#allocation3], 4294965248  ;;  %p312_p4 = scmp.lt.s32.totalorder %s1996_s24, 1  ;;  %v2009_v0 = vmov 0.0   ;;  %v2010_v1 = vmov 0   ;;  %s1628_s16 = sshll.u32 %s1996_s24, 6 }
  0x38   : > { %578 = vmatprep.mubr.f32.mxu0 %v2009_v0  ;;  %1821 = vset.pattern.permute.xlu0 %v2010_v1  ;;  %s2282_s20 = scalar_lea.vmem %s2633_s5, %s1628_s16  ;;  %vm501_vm10 = vcmask 261120   ;;  %s308_s17 = sand.u32 1, %s1988_s22  }
  0x39   : > { %s2145_s15 = scalar_select %p312_p4, %s1996_s24, 1  ;;  %1822 = vset.pattern.permute.xlu1 %v2010_v1  ;;  %1151 = vmatprep.mubr.f32.mxu1 %v2009_v0 }
  0x3a   : > { %s1660_s14 = sshll.u32 %s1996_s24, 10  ;;  %s2582_s24 = scalar_lea.sflag [#allocation4], %s308_s17 }
  0x3b   : > { %s1658_s11 = sshll.u32 %s2145_s15, 6  ;;  %s1583_s15 = sshll.u32 %s308_s17, 6 }
  0x3c   : > { %s2154_s18 = scalar_lea.vmem %s2628_s0, %s1658_s11  ;;  %s2192_s27 = scalar_lea.vmem %s2629_s1, %s1658_s11 }
  0x3d   : > { %v2157_v2 = vld [vmem:[%s2154_s18 + $0x8] sm:$0xff]  ;;  %v2160_v3 = vld [vmem:[%s2154_s18 + $0x18] sm:$0xff]  ;;  %v2163_v4 = vld [vmem:[%s2154_s18] sm:$0xff]  ;;  %s2551_s11 = scalar_lea.vmem [#allocation5], %s1583_s15  ;;  %p2646_p10 = scmp.ne.s32.totalorder %s2639_s7, 0 }
  0x3e   : > { %v349_v5 = vand.u32 2147483647, %v2157_v2  ;;  %v351_v6 = vand.u32 2147483647, %v2160_v3  ;;  %v2168_v7 = vld [vmem:[%s2154_s18 + $0x10] sm:$0xff]  ;;  %v2173_v12 = vld [vmem:[%s2154_s18 + $0x28] sm:$0xff] }
  0x3f   : > { %v348_v8 = vand.u32 2147483647, %v2163_v4  ;;  %v350_v11 = vand.u32 2147483647, %v2168_v7  ;;  %v2176_v14 = vld [vmem:[%s2154_s18 + $0x38] sm:$0xff]  ;;  %v2181_v23 = vld [vmem:[%s2154_s18 + $0x20] sm:$0xff] }
  0x40   : > { %v357_v9 = vsub.f32 0.0, %v349_v5  ;;  %v359_v10 = vsub.f32 0.0, %v351_v6  ;;  %v353_v15 = vand.u32 2147483647, %v2173_v12  ;;  %v355_v20 = vand.u32 2147483647, %v2176_v14 }
  0x41   : > { %v356_v13 = vsub.f32 0.0, %v348_v8  ;;  %v358_v18 = vsub.f32 0.0, %v350_v11  ;;  %v2184_v24 = vld [vmem:[%s2154_s18 + $0x30] sm:$0xff]  ;;  %v352_v27 = vand.u32 2147483647, %v2181_v23  ;;  %vm389_vm0 = vcmp.gt.f32.partialorder %v2157_v2, 0.0 }
  0x42   : > { %v366_v16 = vmul.f32 1.442695, %v357_v9  ;;  %v370_v17 = vmul.f32 1.442695, %v359_v10  ;;  %v361_v21 = vsub.f32 0.0, %v353_v15  ;;  %v363_v25 = vsub.f32 0.0, %v355_v20 }
  0x43   : > { %v364_v19 = vmul.f32 1.442695, %v356_v13  ;;  %v368_v22 = vmul.f32 1.442695, %v358_v18  ;;  %v354_v28 = vand.u32 2147483647, %v2184_v24 }
  0x44   : > { %1823 = vpow2.f32 %v366_v16  ;;  %v374_v26 = vmul.f32 1.442695, %v361_v21  ;;  %vm391_vm1 = vcmp.gt.f32.partialorder %v2160_v3, 0.0  ;;  %v405_v29 = vsub.f32 0.0, %v2157_v2  ;;  %v2201_v34 = vld [vmem:[%s2192_s27 + $0x8] sm:$0xff]  ;;  %v2204_v35 = vld [vmem:[%s2192_s27 + $0x18] sm:$0xff] }
  0x45   : > { %1825 = vpow2.f32 %v370_v17  ;;  %v378_v30 = vmul.f32 1.442695, %v363_v25  ;;  %v360_v31 = vsub.f32 0.0, %v352_v27  ;;  %v407_v32 = vsub.f32 0.0, %v2160_v3  ;;  %v2207_v36 = vld [vmem:[%s2192_s27] sm:$0xff]  ;;  %v2215_v43 = vld [vmem:[%s2192_s27 + $0x10] sm:$0xff] }
  0x46   : > { %1827 = vpow2.f32 %v364_v19  ;;  %vm388_vm2 = vcmp.gt.f32.partialorder %v2163_v4, 0.0  ;;  %v362_v33 = vsub.f32 0.0, %v354_v28  ;;  %v421_v38 = vand.u32 2147483647, %v2201_v34  ;;  %v2222_v48 = vld [vmem:[%s2192_s27 + $0x28] sm:$0xff]  ;;  %v2228_v56 = vld [vmem:[%s2192_s27 + $0x38] sm:$0xff] }
  0x47   : > { %1829 = vpow2.f32 %v368_v22  ;;  %v372_v37 = vmul.f32 1.442695, %v360_v31  ;;  %v423_v39 = vand.u32 2147483647, %v2204_v35  ;;  %vm390_vm3 = vcmp.gt.f32.partialorder %v2168_v7, 0.0  ;;  %v2234_v61 = vld [vmem:[%s2192_s27 + $0x20] sm:$0xff] }
  0x48   : > { %1831 = vpow2.f32 %v374_v26  ;;  %v404_v40 = vsub.f32 0.0, %v2163_v4  ;;  %v406_v41 = vsub.f32 0.0, %v2168_v7  ;;  %v376_v42 = vmul.f32 1.442695, %v362_v33  ;;  %v932_v26 = vld [vmem:[%s2631_s3] sm:$0xff]  ;;  %v934_v27 = vld [vmem:[%s2631_s3 + $0x10] sm:$0xff] }
  0x49   : > { %1833 = vpow2.f32 %v378_v30  ;;  %v429_v44 = vsub.f32 0.0, %v421_v38  ;;  %v431_v45 = vsub.f32 0.0, %v423_v39  ;;  %v420_v46 = vand.u32 2147483647, %v2207_v36  ;;  %938 = vperm.xlu0 %1821, %v932_v26   ;;  %948 = vperm.xlu1 %1822, %v934_v27   ;;  %v935_v38 = vld [vmem:[%s2631_s3 + $0x18] sm:$0xff]  ;;  %v499_v27 = vld [vmem:[#allocation2 + $0x30] sm:$0xff] }
  0x4a   : > { %1835 = vpow2.f32 %v372_v37  ;;  %vm393_vm4 = vcmp.gt.f32.partialorder %v2173_v12, 0.0  ;;  %vm395_vm5 = vcmp.gt.f32.partialorder %v2176_v14, 0.0  ;;  %v422_v47 = vand.u32 2147483647, %v2215_v43  ;;  %v2266_v37 = vld [vmem:[%s2192_s27 + $0x30] sm:$0xff]  ;;  %s1465_s12 = sshll.u32 %s2551_s11, 4  ;;  %s2573_s27 = scalar_lea.hbm %s2634_s6, %s1660_s14  ;;  %s2575_s12 = int_to_ptr.vmem [resolvable:$true] %s1465_s12 }
  0x4b   : > { %1837 = vpow2.f32 %v376_v42  ;;  %v409_v49 = vsub.f32 0.0, %v2173_v12  ;;  %v438_v50 = vmul.f32 1.442695, %v429_v44  ;;  %v442_v51 = vmul.f32 1.442695, %v431_v45  ;;  %s1922_s28 = scalar_lea.vmem %s2575_s12, 1024 }
  0x4c   : > { %v428_v52 = vsub.f32 0.0, %v420_v46  ;;  %v411_v54 = vsub.f32 0.0, %v2176_v14  ;;  %vm392_vm6 = vcmp.gt.f32.partialorder %v2181_v23, 0.0  ;;  %v430_v55 = vsub.f32 0.0, %v422_v47  ;;  %p1923_p8 = scmp.ne.s32.totalorder %s2575_s12, %s1922_s28  ;;  %s2011_s30 = smov [#allocation5]  }
  0x4d   : > { %v425_v57 = vand.u32 2147483647, %v2222_v48  ;;  %vm394_vm7 = vcmp.gt.f32.partialorder %v2184_v24, 0.0  ;;  %v408_v60 = vsub.f32 0.0, %v2181_v23  ;;  %1839 = vpow2.f32 %v438_v50  ;;  %953 = vperm.xlu1 %1822, %v935_v38   ;;  %s1926_s8 = sshll.u32 %s2011_s30, 4  ;;  %s1927_s8 = int_to_ptr.vmem [resolvable:$false] %s1926_s8 }
  0x4e   : > { %v1824_v53 = vpop.eup %1823  ;;  %v410_v1 = vsub.f32 0.0, %v2184_v24  ;;  %1841 = vpow2.f32 %v442_v51  ;;  %v436_v5 = vmul.f32 1.442695, %v428_v52  ;;  %v440_v10 = vmul.f32 1.442695, %v430_v55  ;;  %p1924_p11 = pnand %p1923_p8, %p2646_p10  ;;  %s1928_s13 = scalar_lea.vmem %s1927_s8, 2048 }
  0x4f   : > { %v1826_v58 = vpop.eup %1825  ;;  %v1589_v59 = vadd.f32 -1.0, %v1824_v53  ;;  %v427_v11 = vand.u32 2147483647, %v2228_v56  ;;  %v433_v17 = vsub.f32 0.0, %v425_v57  ;;  %v424_v18 = vand.u32 2147483647, %v2234_v61  ;;  %p1929_p1 = scmp.lt.s32.totalorder %s2575_s12, %s1927_s8  ;;  %p1930_p3 = scmp.lt.s32.totalorder %s1928_s13, %s1922_s28 }
  0x50   : > { %v1828_v62 = vpop.eup %1827  ;;  %v1591_v63 = vadd.f32 -1.0, %v1826_v58  ;;  %1843 = vpow2.f32 %v436_v5  ;;  %v426_v52 = vand.u32 2147483647, %v2266_v37  ;;  %v1042_v58 = vld [vmem:[%s2282_s20 + $0x20] sm:$0xff]  ;;  %vm461_vm8 = vcmp.gt.f32.partialorder %v2201_v34, 0.0  ;;  %p1925_p13 = pneg %p1924_p11 }
  0x51   : > { %v1830_v6 = vpop.eup %1829  ;;  %v413_v8 = vsel %vm389_vm0, %v1589_v59, %v405_v29  ;;  %v1588_v9 = vadd.f32 -1.0, %v1828_v62  ;;  %v397_v25 = vsel %vm389_vm0, %v2157_v2, %v1589_v59  ;;  %1845 = vpow2.f32 %v440_v10  ;;  %v1043_v62 = vld [vmem:[%s2282_s20 + $0x28] sm:$0xff]  ;;  %p1931_p5 = por %p1930_p3, %p1929_p1 }
  0x52   : > { %v1832_v13 = vpop.eup %1831  ;;  %v415_v15 = vsel %vm391_vm1, %v1591_v63, %v407_v32  ;;  %v1590_v16 = vadd.f32 -1.0, %v1830_v6  ;;  %v399_v30 = vsel %vm391_vm1, %v2160_v3, %v1591_v63  ;;  %v933_v3 = vld [vmem:[%s2631_s3 + $0x8] sm:$0xff]  ;;  %v435_v44 = vsub.f32 0.0, %v427_v11  ;;  %1364 = vperm.xlu1 %1822, %v1043_v62   ;;  %v495_v62 = vld [vmem:[#allocation2 + $0x18] sm:$0xff] }
  0x53   : > { %v1834_v19 = vpop.eup %1833  ;;  %v1661_v20 = vpack.c.bf16 %v415_v15, %v413_v8  ;;  %v412_v21 = vsel %vm388_vm2, %v1588_v9, %v404_v40  ;;  %v1593_v22 = vadd.f32 -1.0, %v1832_v13  ;;  %v396_v31 = vsel %vm388_vm2, %v2163_v4, %v1588_v9  ;;  %943 = vperm.xlu0 %1821, %v933_v3   ;;  %v500_v3 = vld [vmem:[#allocation2 + $0x38] sm:$0xff]  ;;  %p1932_p6 = pnand %p1931_p5, %p1925_p13 }
  0x54   : > { %v414_v28 = vsel %vm390_vm3, %v1590_v16, %v406_v41  ;;  %v1595_v29 = vadd.f32 -1.0, %v1834_v19  ;;  %v1836_v2 = vpop.eup %1835  ;;  %v398_v40 = vsel %vm390_vm3, %v2168_v7, %v1590_v16  ;;  %v1669_v47 = vpack.c.bf16 %v399_v30, %v397_v25  ;;  %v1039_v25 = vld [vmem:[%s2282_s20 + $0x8] sm:$0xff] }
  0x55   : > { %1662 = vmatprep.subr.bf16.mxu0 %v1661_v20  ;;  %v1663_v32 = vpack.c.bf16 %v414_v28, %v412_v21  ;;  %v417_v33 = vsel %vm393_vm4, %v1593_v22, %v409_v49  ;;  %v1838_v39 = vpop.eup %1837  ;;  %v1592_v42 = vadd.f32 -1.0, %v1836_v2  ;;  %v446_v49 = vmul.f32 1.442695, %v433_v17  ;;  %v1038_v21 = vld [vmem:[%s2282_s20] sm:$0xff] }
  0x56   : > { %v419_v41 = vsel %vm395_vm5, %v1595_v29, %v411_v54  ;;  %v1594_v46 = vadd.f32 -1.0, %v1838_v39  ;;  %v401_v7 = vsel %vm393_vm4, %v2173_v12, %v1593_v22  ;;  %v450_v51 = vmul.f32 1.442695, %v435_v44 }
  0x57   : > { %1664 = vmatpush1.bf16.msra.mxu0 %v1663_v32  ;;  %v1665_v45 = vpack.c.bf16 %v419_v41, %v417_v33  ;;  %v416_v50 = vsel %vm392_vm6, %v1592_v42, %v408_v60  ;;  %v1840_v53 = vpop.eup %1839  ;;  %v403_v55 = vsel %vm395_vm5, %v2176_v14, %v1595_v29  ;;  %1847 = vpow2.f32 %v446_v49  ;;  %v497_v14 = vld [vmem:[#allocation2 + $0x20] sm:$0xff]  ;;  %1359 = vperm.xlu0 %1821, %v1042_v58   ;;  %v1041_v33 = vld [vmem:[%s2282_s20 + $0x18] sm:$0xff] }
  0x58   : > { %v418_v54 = vsel %vm394_vm7, %v1594_v46, %v410_v1  ;;  %v432_v57 = vsub.f32 0.0, %v424_v18  ;;  %v1842_v59 = vpop.eup %1841  ;;  %v2296_v60 = vadd.f32 -1.0, %v1840_v53  ;;  %1849 = vpow2.f32 %v450_v51  ;;  %v498_v18 = vld [vmem:[#allocation2 + $0x28] sm:$0xff]  ;;  %v492_v49 = vld [vmem:[#allocation2] sm:$0xff] }
  0x59   : > { %1666 = vmatprep.subr.bf16.mxu0 %v1665_v45  ;;  %v1667_v12 = vpack.c.bf16 %v418_v54, %v416_v50  ;;  %v2300_v63 = vadd.f32 -1.0, %v1842_v59  ;;  %vm463_vm9 = vcmp.gt.f32.partialorder %v2204_v35, 0.0  ;;  %v434_v1 = vsub.f32 0.0, %v426_v52  ;;  %v494_v59 = vld [vmem:[#allocation2 + $0x10] sm:$0xff] }
  0x5a   : > { %v444_v5 = vmul.f32 1.442695, %v432_v57  ;;  %v1671_v6 = vpack.c.bf16 %v398_v40, %v396_v31  ;;  %v1673_v8 = vpack.c.bf16 %v403_v55, %v401_v7  ;;  %v400_v9 = vsel %vm392_vm6, %v2181_v23, %v1592_v42  ;;  %v1844_v13 = vpop.eup %1843  ;;  %v1044_v23 = vld [vmem:[%s2282_s20 + $0x30] sm:$0xff]  ;;  %v493_v55 = vld [vmem:[#allocation2 + $0x8] sm:$0xff] }
  0x5b   : > { %1668 = vmatpush1.bf16.msra.mxu0 %v1667_v12  ;;  %v402_v10 = vsel %vm394_vm7, %v2184_v24, %v1594_v46  ;;  %v448_v11 = vmul.f32 1.442695, %v434_v1  ;;  %v469_v15 = vsel %vm461_vm8, %v2201_v34, %v2296_v60  ;;  %v471_v16 = vsel %vm463_vm9, %v2204_v35, %v2300_v63  ;;  %v1846_v17 = vpop.eup %1845  ;;  %v1045_v24 = vld [vmem:[%s2282_s20 + $0x38] sm:$0xff]  ;;  %1369 = vperm.xlu0 %1821, %v1044_v23   ;;  %v1040_v31 = vld [vmem:[%s2282_s20 + $0x10] sm:$0xff] }
  0x5c   : > { %1670 = vmatprep.subr.bf16.mxu0 %v1669_v47  ;;  %1851 = vpow2.f32 %v444_v5  ;;  %v1675_v19 = vpack.c.bf16 %v402_v10, %v400_v9  ;;  %v1677_v20 = vpack.c.bf16 %v471_v16, %v469_v15  ;;  %1374 = vperm.xlu1 %1822, %v1045_v24   ;;  %v1596_v28 = vadd.f32 -1.0, %v1844_v13  ;;  %v705_v9 = vld [vmem:[#allocation2 + $0x40] sm:$0xff]  ;;  %v707_v13 = vld [vmem:[#allocation2 + $0x50] sm:$0xff]  ;;  %v820_v15 = vld [vmem:[#allocation2 + $0x68] sm:$0xff] }
  0x5d   : > { %1853 = vpow2.f32 %v448_v11  ;;  %v1598_v29 = vadd.f32 -1.0, %v1846_v17  ;;  %vm460_vm11 = vcmp.gt.f32.partialorder %v2207_v36, 0.0  ;;  %vm462_vm12 = vcmp.gt.f32.partialorder %v2215_v43, 0.0  ;;  %v821_v16 = vld [vmem:[#allocation2 + $0x70] sm:$0xff]  ;;  %v822_v23 = vld [vmem:[#allocation2 + $0x78] sm:$0xff] }
  0x5e   : > { %1604 = vmatmul.mubr.msk.f32.vlgmr.msra.gmra.mrb[0].mxu0 %vm501_vm10, %v497_v14  ;;  %vm465_vm13 = vcmp.gt.f32.partialorder %v2222_v48, 0.0  ;;  %vm467_vm14 = vcmp.gt.f32.partialorder %v2228_v56, 0.0  ;;  %vm464_vm15 = vcmp.gt.f32.partialorder %v2234_v61, 0.0  ;;  %vm466_vm0 = vcmp.gt.f32.partialorder %v2266_v37, 0.0 }
  0x5f   : > { %1672 = vmatpush1.bf16.msra.mxu0 %v1671_v6  ;;  %584 = vmatprep.mubr.f32.mxu0 %v2009_v0  ;;  %v468_v39 = vsel %vm460_vm11, %v2207_v36, %v1596_v28  ;;  %v470_v40 = vsel %vm462_vm12, %v2215_v43, %v1598_v29  ;;  %v477_v42 = vsub.f32 0.0, %v2201_v34  ;;  %v479_v47 = vsub.f32 0.0, %v2204_v35 }
  0x60   : > { %1674 = vmatprep.subr.bf16.mxu0 %v1673_v8  ;;  %1339 = vperm.xlu0 %1821, %v1038_v21   ;;  %v1679_v50 = vpack.c.bf16 %v470_v40, %v468_v39  ;;  %v476_v34 = vsub.f32 0.0, %v2207_v36  ;;  %v478_v35 = vsub.f32 0.0, %v2215_v43  ;;  %v481_v12 = vsub.f32 0.0, %v2222_v48 }
  0x61   : > { %v1848_v22 = vpop.eup %1847  ;;  %1344 = vperm.xlu1 %1822, %v1039_v25   ;;  %v485_v53 = vsel %vm461_vm8, %v2296_v60, %v477_v42  ;;  %v487_v54 = vsel %vm463_vm9, %v2300_v63, %v479_v47  ;;  %v483_v60 = vsub.f32 0.0, %v2228_v56  ;;  %v480_v5 = vsub.f32 0.0, %v2234_v61 }
  0x62   : > { %1605 = vmatmul.mubr.msk.f32.gmra.mrb[2].mxu0 %vm501_vm10, %v498_v18  ;;  %v1850_v26 = vpop.eup %1849  ;;  %v1601_v30 = vadd.f32 -1.0, %v1848_v22  ;;  %v1685_v58 = vpack.c.bf16 %v487_v54, %v485_v53  ;;  %v484_v63 = vsel %vm460_vm11, %v1596_v28, %v476_v34  ;;  %v486_v1 = vsel %vm462_vm12, %v1598_v29, %v478_v35 }
  0x63   : > { %590 = vmatprep.mubr.f32.mxu0 %v2009_v0  ;;  %1676 = vmatpush1.bf16.msra.mxu0 %v1675_v19  ;;  %v1603_v2 = vadd.f32 -1.0, %v1850_v26  ;;  %v482_v14 = vsub.f32 0.0, %v2266_v37  ;;  %v1687_v36 = vpack.c.bf16 %v486_v1, %v484_v63 }
  0x64   : > { %1678 = vmatprep.subr.bf16.mxu0 %v1677_v20  ;;  %1349 = vperm.xlu0 %1821, %v1040_v31   ;;  %v473_v44 = vsel %vm465_vm13, %v2222_v48, %v1601_v30  ;;  %v489_v6 = vsel %vm465_vm13, %v1601_v30, %v481_v12  ;;  %v706_v48 = vld [vmem:[#allocation2 + $0x48] sm:$0xff] }
  0x65   : > { %v475_v45 = vsel %vm467_vm14, %v2228_v56, %v1603_v2  ;;  %1354 = vperm.xlu1 %1822, %v1041_v33   ;;  %v491_v8 = vsel %vm467_vm14, %v1603_v2, %v483_v60 }
  0x66   : > { %v1852_v32 = vpop.eup %1851  ;;  %1606 = vmatmul.mubr.msk.f32.gmra.mrb[4].mxu0 %vm501_vm10, %v499_v27  ;;  %v1681_v7 = vpack.c.bf16 %v475_v45, %v473_v44  ;;  %v1689_v10 = vpack.c.bf16 %v491_v8, %v489_v6 }
  0x67   : > { %596 = vmatprep.mubr.f32.mxu0 %v2009_v0  ;;  %v1854_v38 = vpop.eup %1853  ;;  %v1600_v41 = vadd.f32 -1.0, %v1852_v32 }
  0x68   : > { %v1602_v46 = vadd.f32 -1.0, %v1854_v38 }
  0x69   : > { %v472_v51 = vsel %vm464_vm15, %v2234_v61, %v1600_v41  ;;  %v488_v43 = vsel %vm464_vm15, %v1600_v41, %v480_v5  ;;  %v708_v61 = vld [vmem:[#allocation2 + $0x58] sm:$0xff] }
  0x6a   : > { %1607 = vmatmul.mubr.msk.f32.gmra.mrb[6].mxu0 %vm501_vm10, %v500_v3  ;;  %v474_v52 = vsel %vm466_vm0, %v2266_v37, %v1602_v46  ;;  %v490_v11 = vsel %vm466_vm0, %v1602_v46, %v482_v14  ;;  %v819_v37 = vld [vmem:[#allocation2 + $0x60] sm:$0xff] }
  0x6b   : > { %679 = vmatprep.mubr.f32.mxu0 %v2009_v0  ;;  %v1683_v57 = vpack.c.bf16 %v474_v52, %v472_v51  ;;  %v1691_v56 = vpack.c.bf16 %v490_v11, %v488_v43 }
  0x6e   : > { %1608 = vmatmul.mubr.msk.f32.vlgmr.msra.gmra.mrb[0].mxu0 %vm501_vm10, %v492_v49 }
  0x6f   : > { %1680 = vmatpush1.bf16.msra.mxu0 %v1679_v50  ;;  %685 = vmatprep.mubr.f32.mxu0 %v2009_v0 }
  0x70   : > { %1682 = vmatprep.subr.bf16.mxu0 %v1681_v7 }
  0x72   : > { %1609 = vmatmul.mubr.msk.f32.gmra.mrb[2].mxu0 %vm501_vm10, %v493_v55 }
  0x73   : > { %691 = vmatprep.mubr.f32.mxu0 %v2009_v0  ;;  %1684 = vmatpush1.bf16.msra.mxu0 %v1683_v57 }
  0x74   : > { %1686 = vmatprep.subr.bf16.mxu0 %v1685_v58 }
  0x76   : > { %1610 = vmatmul.mubr.msk.f32.gmra.mrb[4].mxu0 %vm501_vm10, %v494_v59 }
  0x77   : > { %697 = vmatprep.mubr.f32.mxu0 %v2009_v0 }
  0x7a   : > { %1611 = vmatmul.mubr.msk.f32.gmra.mrb[6].mxu0 %vm501_vm10, %v495_v62 }
  0x7b   : > { %785 = vmatprep.mubr.f32.mxu0 %v2009_v0 }
  0x7e   : > { %1612 = vmatmul.mubr.msk.f32.vlgmr.msra.gmra.mrb[0].mxu0 %vm501_vm10, %v705_v9 }
  0x7f   : > { %1688 = vmatpush1.bf16.msra.mxu0 %v1687_v36  ;;  %791 = vmatprep.mubr.f32.mxu0 %v2009_v0 }
  0x80   : > { %1690 = vmatprep.subr.bf16.mxu0 %v1689_v10 }
  0x82   : > { %1613 = vmatmul.mubr.msk.f32.gmra.mrb[2].mxu0 %vm501_vm10, %v706_v48 }
  0x83   : > { %797 = vmatprep.mubr.f32.mxu0 %v2009_v0  ;;  %1692 = vmatpush1.bf16.msra.mxu0 %v1691_v56 }
  0x86   : > { %1614 = vmatmul.mubr.msk.f32.gmra.mrb[4].mxu0 %vm501_vm10, %v707_v13 }
  0x87   : > { %803 = vmatprep.mubr.f32.mxu0 %v2009_v0 }
  0x8a   : > { %1615 = vmatmul.mubr.msk.f32.gmra.mrb[6].mxu0 %vm501_vm10, %v708_v61 }
  0x8b   : > { %899 = vmatprep.mubr.f32.mxu0 %v2009_v0 }
  0x8e   : > { %1616 = vmatmul.mubr.msk.f32.vlgmr.msra.gmra.mrb[0].mxu0 %vm501_vm10, %v819_v37 }
  0x8f   : > { %905 = vmatprep.mubr.f32.mxu0 %v2009_v0 }
  0x92   : > { %1617 = vmatmul.mubr.msk.f32.gmra.mrb[2].mxu0 %vm501_vm10, %v820_v15 }
  0x93   : > { %911 = vmatprep.mubr.f32.mxu0 %v2009_v0 }
  0x96   : > { %1618 = vmatmul.mubr.msk.f32.gmra.mrb[4].mxu0 %vm501_vm10, %v821_v16 }
  0x97   : > { %917 = vmatprep.mubr.f32.mxu0 %v2009_v0 }
  0x9a   : > { %1619 = vmatmul.mubr.msk.f32.gmra.mrb[6].mxu0 %vm501_vm10, %v822_v23 }
  0xc8   : > { %v939_v17 = vpop.permute.xlu0 %938  ;;  %v949_v30 = vpop.permute.xlu1 %948 }
  0xcc   : > { %v954_v49 = vpop.permute.xlu1 %953 }
  0xd2   : > { %v944_v22 = vpop.permute.xlu0 %943 }
 0x161   : > { %v901_v24 = vpop.f32.mrb[0].mxu0 }
 0x162   : > { %v2404_v18 = vadd.f32 %v939_v17, %v901_v24  ;;  %v903_v19 = vpop.f32.mrb[1].mxu0 }
 0x163   : > { %v2406_v20 = vadd.f32 %v939_v17, %v903_v19 }
 0x164   : > { %v964_v21 = vand.u32 2147483647, %v2404_v18  ;;  %vm1004_vm2 = vcmp.gt.f32.partialorder %v2404_v18, 0.0  ;;  %v1020_v36 = vsub.f32 0.0, %v2404_v18 }
 0x165   : > { %v965_v25 = vand.u32 2147483647, %v2406_v20  ;;  %v907_v26 = vpop.f32.mrb[2].mxu0  ;;  %vm1005_vm1 = vcmp.gt.f32.partialorder %v2406_v20, 0.0  ;;  %v1021_v9 = vsub.f32 0.0, %v2406_v20 }
 0x166   : > { %v972_v27 = vsub.f32 0.0, %v964_v21  ;;  %v2410_v28 = vadd.f32 %v944_v22, %v907_v26  ;;  %v909_v29 = vpop.f32.mrb[3].mxu0 }
 0x167   : > { %v973_v2 = vsub.f32 0.0, %v965_v25  ;;  %v2412_v31 = vadd.f32 %v944_v22, %v909_v29 }
 0x168   : > { %v980_v32 = vmul.f32 1.442695, %v972_v27  ;;  %v966_v33 = vand.u32 2147483647, %v2410_v28  ;;  %vm1006_vm4 = vcmp.gt.f32.partialorder %v2410_v28, 0.0  ;;  %v1022_v11 = vsub.f32 0.0, %v2410_v28 }
 0x169   : > { %v967_v3 = vand.u32 2147483647, %v2412_v31  ;;  %v913_v38 = vpop.f32.mrb[4].mxu0  ;;  %v982_v39 = vmul.f32 1.442695, %v973_v2  ;;  %vm1007_vm3 = vcmp.gt.f32.partialorder %v2412_v31, 0.0 }
 0x16a   : > { %v974_v40 = vsub.f32 0.0, %v966_v33  ;;  %v2416_v41 = vadd.f32 %v949_v30, %v913_v38  ;;  %v915_v42 = vpop.f32.mrb[5].mxu0  ;;  %1855 = vpow2.f32 %v980_v32  ;;  %v1023_v56 = vsub.f32 0.0, %v2412_v31 }
 0x16b   : > { %v975_v44 = vsub.f32 0.0, %v967_v3  ;;  %v2418_v45 = vadd.f32 %v949_v30, %v915_v42  ;;  %1857 = vpow2.f32 %v982_v39 }
 0x16c   : > { %v984_v46 = vmul.f32 1.442695, %v974_v40  ;;  %v968_v47 = vand.u32 2147483647, %v2416_v41  ;;  %vm1008_vm6 = vcmp.gt.f32.partialorder %v2416_v41, 0.0 }
 0x16d   : > { %v969_v50 = vand.u32 2147483647, %v2418_v45  ;;  %v919_v7 = vpop.f32.mrb[6].mxu0  ;;  %v986_v51 = vmul.f32 1.442695, %v975_v44  ;;  %v1025_v2 = vsub.f32 0.0, %v2418_v45 }
 0x16e   : > { %v976_v52 = vsub.f32 0.0, %v968_v47  ;;  %v2422_v53 = vadd.f32 %v954_v49, %v919_v7  ;;  %v921_v54 = vpop.f32.mrb[7].mxu0  ;;  %1859 = vpow2.f32 %v984_v46  ;;  %vm1009_vm5 = vcmp.gt.f32.partialorder %v2418_v45, 0.0 }
 0x16f   : > { %v977_v55 = vsub.f32 0.0, %v969_v50  ;;  %v2424_v57 = vadd.f32 %v954_v49, %v921_v54  ;;  %1861 = vpow2.f32 %v986_v51  ;;  %v1629_v54 = vld [vmem:[%s2632_s4 + $0x40] sm:$0xff] }
 0x170   : > { %v988_v58 = vmul.f32 1.442695, %v976_v52  ;;  %v970_v59 = vand.u32 2147483647, %v2422_v53  ;;  %vm1010_vm7 = vcmp.gt.f32.partialorder %v2422_v53, 0.0 }
 0x171   : > { %v990_v34 = vmul.f32 1.442695, %v977_v55  ;;  %v971_v35 = vand.u32 2147483647, %v2424_v57  ;;  %v1027_v32 = vsub.f32 0.0, %v2424_v57  ;;  %vm1011_vm8 = vcmp.gt.f32.partialorder %v2424_v57, 0.0 }
 0x172   : > { %1863 = vpow2.f32 %v988_v58  ;;  %v978_v12 = vsub.f32 0.0, %v970_v59  ;;  %v1633_v55 = vld [vmem:[%s2632_s4 + $0x60] sm:$0xff]  ;;  %v1635_v58 = vld [vmem:[%s2632_s4 + $0x70] sm:$0xff]  ;;  %v1636_v59 = vld [vmem:[%s2632_s4 + $0x78] sm:$0xff] }
 0x173   : > { %1865 = vpow2.f32 %v990_v34  ;;  %v979_v60 = vsub.f32 0.0, %v971_v35  ;;  %v1046_v34 = vld [vmem:[%s2632_s4] sm:$0xff]  ;;  %v1047_v35 = vld [vmem:[%s2632_s4 + $0x8] sm:$0xff] }
 0x174   : > { %v1856_v62 = vpop.eup %1855  ;;  %v992_v63 = vmul.f32 1.442695, %v978_v12  ;;  %v1048_v12 = vld [vmem:[%s2632_s4 + $0x10] sm:$0xff] }
 0x175   : > { %v1858_v1 = vpop.eup %1857  ;;  %v994_v5 = vmul.f32 1.442695, %v979_v60  ;;  %v1620_v14 = vadd.f32 -1.0, %v1856_v62  ;;  %v1049_v60 = vld [vmem:[%s2632_s4 + $0x18] sm:$0xff]  ;;  %v1050_v62 = vld [vmem:[%s2632_s4 + $0x20] sm:$0xff] }
 0x176   : > { %1867 = vpow2.f32 %v992_v63  ;;  %v1621_v6 = vadd.f32 -1.0, %v1858_v1  ;;  %v1051_v63 = vld [vmem:[%s2632_s4 + $0x28] sm:$0xff]  ;;  %v1052_v1 = vld [vmem:[%s2632_s4 + $0x30] sm:$0xff] }
 0x177   : > { %1869 = vpow2.f32 %v994_v5  ;;  %v1012_v13 = vsel %vm1004_vm2, %v2404_v18, %v1620_v14  ;;  %v1028_v61 = vsel %vm1004_vm2, %v1620_v14, %v1020_v36  ;;  %v1053_v5 = vld [vmem:[%s2632_s4 + $0x38] sm:$0xff] }
 0x178   : > { %v1860_v8 = vpop.eup %1859  ;;  %v1029_v37 = vsel %vm1005_vm1, %v1621_v6, %v1021_v9  ;;  %v1013_v23 = vsel %vm1005_vm1, %v2406_v20, %v1621_v6 }
 0x179   : > { %v1862_v10 = vpop.eup %1861  ;;  %v1622_v43 = vadd.f32 -1.0, %v1860_v8 }
 0x17a   : > { %v1623_v48 = vadd.f32 -1.0, %v1862_v10 }
 0x17b   : > { %v1014_v15 = vsel %vm1006_vm4, %v2410_v28, %v1622_v43  ;;  %v1030_v16 = vsel %vm1006_vm4, %v1622_v43, %v1022_v11  ;;  %v1024_v28 = vsub.f32 0.0, %v2416_v41 }
 0x17c   : > { %v1864_v17 = vpop.eup %1863  ;;  %v1031_v24 = vsel %vm1007_vm3, %v1623_v48, %v1023_v56  ;;  %v1695_v19 = vpack.c.bf16 %v1030_v16, %v1028_v61  ;;  %v1015_v21 = vsel %vm1007_vm3, %v2412_v31, %v1623_v48  ;;  %v1703_v22 = vpack.c.bf16 %v1014_v15, %v1012_v13  ;;  %v1365_v15 = vpop.permute.xlu1 %1364 }
 0x17d   : > { %v1866_v25 = vpop.eup %1865  ;;  %v1693_v26 = vpack.c.bf16 %v1031_v24, %v1029_v37  ;;  %v1701_v18 = vpack.c.bf16 %v1015_v21, %v1013_v23  ;;  %v1624_v27 = vadd.f32 -1.0, %v1864_v17  ;;  %v1026_v31 = vsub.f32 0.0, %v2422_v53 }
 0x17e   : > { %v1625_v29 = vadd.f32 -1.0, %v1866_v25 }
 0x17f   : > { %1694 = vmatprep.subr.bf16.mxu1 %v1693_v26  ;;  %v1032_v38 = vsel %vm1008_vm6, %v1624_v27, %v1024_v28  ;;  %v1016_v39 = vsel %vm1008_vm6, %v2416_v41, %v1624_v27  ;;  %v1630_v41 = vld [vmem:[%s2632_s4 + $0x48] sm:$0xff] }
 0x180   : > { %v1868_v30 = vpop.eup %1867  ;;  %1696 = vmatpush1.bf16.msra.mxu1 %v1695_v19  ;;  %v1033_v40 = vsel %vm1009_vm5, %v1625_v29, %v1025_v2  ;;  %v1017_v44 = vsel %vm1009_vm5, %v2418_v45, %v1625_v29  ;;  %v1631_v45 = vld [vmem:[%s2632_s4 + $0x50] sm:$0xff]  ;;  %v1375_v28 = vpop.permute.xlu1 %1374 }
 0x181   : > { %v1870_v20 = vpop.eup %1869  ;;  %v1626_v33 = vadd.f32 -1.0, %v1868_v30 }
 0x182   : > { %v1627_v3 = vadd.f32 -1.0, %v1870_v20 }
 0x183   : > { %v1034_v42 = vsel %vm1010_vm7, %v1626_v33, %v1026_v31  ;;  %v1018_v46 = vsel %vm1010_vm7, %v2422_v53, %v1626_v33  ;;  %v1632_v53 = vld [vmem:[%s2632_s4 + $0x58] sm:$0xff] }
 0x184   : > { %v1035_v47 = vsel %vm1011_vm8, %v1627_v3, %v1027_v32  ;;  %v1699_v49 = vpack.c.bf16 %v1034_v42, %v1032_v38  ;;  %v1019_v50 = vsel %vm1011_vm8, %v2424_v57, %v1627_v3  ;;  %v1707_v7 = vpack.c.bf16 %v1018_v46, %v1016_v39  ;;  %v1634_v57 = vld [vmem:[%s2632_s4 + $0x68] sm:$0xff] }
 0x185   : > { %v1697_v51 = vpack.c.bf16 %v1035_v47, %v1033_v40  ;;  %v1705_v52 = vpack.c.bf16 %v1019_v50, %v1017_v44 }
 0x187   : > { %1698 = vmatprep.subr.bf16.mxu1 %v1697_v51 }
 0x188   : > { %1700 = vmatpush1.bf16.msra.mxu1 %v1699_v49 }
 0x189   : > { %1702 = vmatprep.subr.bf16.mxu1 %v1701_v18 }
 0x18b   : > { %1637 = vmatmul.mubr.msk.f32.vlgmr.msra.gmra.mrb[0].mxu1 %vm501_vm10, %v1629_v54 }
 0x18c   : > { %1704 = vmatpush1.bf16.msra.mxu1 %v1703_v22  ;;  %1157 = vmatprep.mubr.f32.mxu1 %v2009_v0 }
 0x18d   : > { %1706 = vmatprep.subr.bf16.mxu1 %v1705_v52 }
 0x18f   : > { %1638 = vmatmul.mubr.msk.f32.gmra.mrb[2].mxu1 %vm501_vm10, %v1630_v41 }
 0x190   : > { %1708 = vmatpush1.bf16.msra.mxu1 %v1707_v7  ;;  %1163 = vmatprep.mubr.f32.mxu1 %v2009_v0 }
 0x193   : > { %1639 = vmatmul.mubr.msk.f32.gmra.mrb[4].mxu1 %vm501_vm10, %v1631_v45  ;;  %v1345_v45 = vpop.permute.xlu1 %1344 }
 0x194   : > { %1169 = vmatprep.mubr.f32.mxu1 %v2009_v0 }
 0x197   : > { %1640 = vmatmul.mubr.msk.f32.gmra.mrb[6].mxu1 %vm501_vm10, %v1632_v53 }
 0x198   : > { %1175 = vmatprep.mubr.f32.mxu1 %v2009_v0 }
 0x19b   : > { %1641 = vmatmul.mubr.msk.f32.gmra.mrb[8].mxu1 %vm501_vm10, %v1633_v55 }
 0x19c   : > { %1181 = vmatprep.mubr.f32.mxu1 %v2009_v0 }
 0x19f   : > { %1642 = vmatmul.mubr.msk.f32.gmra.mrb[10].mxu1 %vm501_vm10, %v1634_v57 }
 0x1a0   : > { %1187 = vmatprep.mubr.f32.mxu1 %v2009_v0 }
 0x1a3   : > { %1643 = vmatmul.mubr.msk.f32.gmra.mrb[12].mxu1 %vm501_vm10, %v1635_v58 }
 0x1a4   : > { %1193 = vmatprep.mubr.f32.mxu1 %v2009_v0 }
 0x1a7   : > { %1644 = vmatmul.mubr.msk.f32.gmra.mrb[14].mxu1 %vm501_vm10, %v1636_v59 }
 0x1a8   : > { %1288 = vmatprep.mubr.f32.mxu1 %v2009_v0 }
 0x1ab   : > { %1645 = vmatmul.mubr.msk.f32.vlgmr.msra.gmra.mrb[0].mxu1 %vm501_vm10, %v1046_v34 }
 0x1ac   : > { %1294 = vmatprep.mubr.f32.mxu1 %v2009_v0 }
 0x1af   : > { %1646 = vmatmul.mubr.msk.f32.gmra.mrb[2].mxu1 %vm501_vm10, %v1047_v35 }
 0x1b0   : > { %1300 = vmatprep.mubr.f32.mxu1 %v2009_v0 }
 0x1b3   : > { %1647 = vmatmul.mubr.msk.f32.gmra.mrb[4].mxu1 %vm501_vm10, %v1048_v12  ;;  %v1887_v12 = vld [vmem:[%s2154_s18 + $0x8] sm:$0xff] }
 0x1b4   : > { %1306 = vmatprep.mubr.f32.mxu1 %v2009_v0 }
 0x1b7   : > { %1648 = vmatmul.mubr.msk.f32.gmra.mrb[6].mxu1 %vm501_vm10, %v1049_v60 }
 0x1b8   : > { %1312 = vmatprep.mubr.f32.mxu1 %v2009_v0 }
 0x1bb   : > { %1649 = vmatmul.mubr.msk.f32.gmra.mrb[8].mxu1 %vm501_vm10, %v1050_v62 }
 0x1bc   : > { %1318 = vmatprep.mubr.f32.mxu1 %v2009_v0 }
 0x1bf   : > { %1650 = vmatmul.mubr.msk.f32.gmra.mrb[10].mxu1 %vm501_vm10, %v1051_v63 }
 0x1c0   : > { %1324 = vmatprep.mubr.f32.mxu1 %v2009_v0 }
 0x1c3   : > { %1651 = vmatmul.mubr.msk.f32.gmra.mrb[12].mxu1 %vm501_vm10, %v1052_v1 }
 0x1c4   : > { %1330 = vmatprep.mubr.f32.mxu1 %v2009_v0  ;;  %v1360_v0 = vpop.permute.xlu0 %1359 }
 0x1c7   : > { %1652 = vmatmul.mubr.msk.f32.gmra.mrb[14].mxu1 %vm501_vm10, %v1053_v5 }
 0x1c8   : > { %v1370_v22 = vpop.permute.xlu0 %1369 }
 0x1cc   : > { %v1340_v44 = vpop.permute.xlu0 %1339 }
 0x27e   : > { %v1290_v14 = vpop.f32.mrb[0].mxu1 }
 0x27f   : > { %v1292_v6 = vpop.f32.mrb[1].mxu1  ;;  %v1377_v47 = vadd.f32 %v1340_v44, %v1290_v14  ;;  %v1350_v14 = vpop.permute.xlu0 %1349 }
 0x280   : > { %v1378_v7 = vadd.f32 %v1340_v44, %v1292_v6 }
 0x282   : > { %v1296_v8 = vpop.f32.mrb[2].mxu1 }
 0x283   : > { %v2535_v9 = vpop.f32.mrb[3].mxu1  ;;  %v1379_v57 = vadd.f32 %v1345_v45, %v1296_v8 }
 0x284   : > { %v1380_v35 = vadd.f32 %v1345_v45, %v2535_v9  ;;  %v1888_v9 = vld [vmem:[%s2154_s18 + $0x10] sm:$0xff] }
 0x286   : > { %v2537_v36 = vpop.f32.mrb[4].mxu1 }
 0x287   : > { %v2539_v10 = vpop.f32.mrb[5].mxu1  ;;  %v1381_v8 = vadd.f32 %v1350_v14, %v2537_v36 }
 0x28a   : > { %v2541_v43 = vpop.f32.mrb[6].mxu1 }
 0x28b   : > { %v2543_v11 = vpop.f32.mrb[7].mxu1 }
 0x28e   : > { %v1314_v48 = vpop.f32.mrb[8].mxu1 }
 0x28f   : > { %v1385_v56 = vadd.f32 %v1360_v0, %v1314_v48  ;;  %v1316_v13 = vpop.f32.mrb[9].mxu1 }
 0x290   : > { %v1386_v61 = vadd.f32 %v1360_v0, %v1316_v13  ;;  %v1382_v13 = vadd.f32 %v1350_v14, %v2539_v10  ;;  %v1890_v10 = vld [vmem:[%s2154_s18 + $0x20] sm:$0xff] }
 0x291   : > { %v1393_v37 = vmul.f32 0.5, %v1385_v56 }
 0x292   : > { %v1394_v16 = vmul.f32 0.5, %v1386_v61  ;;  %v1320_v23 = vpop.f32.mrb[10].mxu1  ;;  %v1889_v61 = vld [vmem:[%s2154_s18 + $0x18] sm:$0xff] }
 0x293   : > { %1871 = vtanh.f32 %v1393_v37  ;;  %v1387_v17 = vadd.f32 %v1365_v15, %v1320_v23  ;;  %v1322_v24 = vpop.f32.mrb[11].mxu1 }
 0x294   : > { %1873 = vtanh.f32 %v1394_v16  ;;  %v1388_v19 = vadd.f32 %v1365_v15, %v1322_v24  ;;  %v1355_v24 = vpop.permute.xlu1 %1354 }
 0x295   : > { %v1395_v21 = vmul.f32 0.5, %v1387_v17 }
 0x296   : > { %v1396_v25 = vmul.f32 0.5, %v1388_v19  ;;  %v1326_v26 = vpop.f32.mrb[12].mxu1 }
 0x297   : > { %1875 = vtanh.f32 %v1395_v21  ;;  %v1389_v18 = vadd.f32 %v1370_v22, %v1326_v26  ;;  %v1328_v27 = vpop.f32.mrb[13].mxu1  ;;  %v1383_v21 = vadd.f32 %v1355_v24, %v2541_v43  ;;  %v1384_v26 = vadd.f32 %v1355_v24, %v2543_v11  ;;  %v1892_v43 = vld [vmem:[%s2154_s18 + $0x30] sm:$0xff]  ;;  %v1893_v11 = vld [vmem:[%s2154_s18 + $0x38] sm:$0xff] }
 0x298   : > { %1877 = vtanh.f32 %v1396_v25  ;;  %v1390_v29 = vadd.f32 %v1370_v22, %v1328_v27 }
 0x299   : > { %v1397_v30 = vmul.f32 0.5, %v1389_v18  ;;  %v1891_v18 = vld [vmem:[%s2154_s18 + $0x28] sm:$0xff] }
 0x29a   : > { %v1398_v2 = vmul.f32 0.5, %v1390_v29  ;;  %v1332_v20 = vpop.f32.mrb[14].mxu1 }
 0x29b   : > { %1879 = vtanh.f32 %v1397_v30  ;;  %v1391_v31 = vadd.f32 %v1375_v28, %v1332_v20  ;;  %v1334_v32 = vpop.f32.mrb[15].mxu1 }
 0x29c   : > { %1881 = vtanh.f32 %v1398_v2  ;;  %v1392_v33 = vadd.f32 %v1375_v28, %v1334_v32 }
 0x29d   : > { %v1872_v3 = vpop.eup %1871  ;;  %v1399_v38 = vmul.f32 0.5, %v1391_v31 }
 0x29e   : > { %v1874_v39 = vpop.eup %1873  ;;  %v1409_v40 = vmul.f32 0.5, %v1872_v3  ;;  %v1400_v42 = vmul.f32 0.5, %v1392_v33 }
 0x29f   : > { %v1410_v46 = vmul.f32 0.5, %v1874_v39  ;;  %1883 = vtanh.f32 %v1399_v38 }
 0x2a0   : > { %v1417_v49 = vadd.f32 0.5, %v1409_v40  ;;  %1885 = vtanh.f32 %v1400_v42 }
 0x2a1   : > { %v1876_v50 = vpop.eup %1875  ;;  %v1418_v51 = vadd.f32 0.5, %v1410_v46 }
 0x2a2   : > { %v1878_v52 = vpop.eup %1877  ;;  %v1425_v54 = vmul.f32 %v1417_v49, %v1377_v47  ;;  %v1411_v41 = vmul.f32 0.5, %v1876_v50 }
 0x2a3   : > { %v1426_v53 = vmul.f32 %v1418_v51, %v1378_v7  ;;  %v1412_v55 = vmul.f32 0.5, %v1878_v52 }
 0x2a4   : > { %v1433_v58 = vadd.f32 %v1425_v54, %v2163_v4  ;;  %v1419_v59 = vadd.f32 0.5, %v1411_v41 }
 0x2a5   : > { %v1880_v34 = vpop.eup %1879  ;;  %v1434_v60 = vadd.f32 %v1887_v12, %v1426_v53  ;;  %v1420_v62 = vadd.f32 0.5, %v1412_v55 }
 0x2a6   : > { %v1882_v63 = vpop.eup %1881  ;;  %1441 = vst [vmem:[%s2551_s11] sm:$0xff] %v1433_v58  ;;  %v1427_v1 = vmul.f32 %v1419_v59, %v1379_v57  ;;  %v1413_v5 = vmul.f32 0.5, %v1880_v34 }
 0x2a7   : > { %1442 = vst [vmem:[%s2551_s11 + $0x8] sm:$0xff] %v1434_v60  ;;  %v1428_v4 = vmul.f32 %v1420_v62, %v1380_v35  ;;  %v1414_v6 = vmul.f32 0.5, %v1882_v63 }
 0x2a8   : > { %v1435_v0 = vadd.f32 %v1888_v9, %v1427_v1  ;;  %v1421_v48 = vadd.f32 0.5, %v1413_v5 }
 0x2a9   : > { %v1884_v56 = vpop.eup %1883  ;;  %v1436_v37 = vadd.f32 %v1889_v61, %v1428_v4  ;;  %v1422_v15 = vadd.f32 0.5, %v1414_v6 }
 0x2aa   : > { %v1886_v16 = vpop.eup %1885  ;;  %1443 = vst [vmem:[%s2551_s11 + $0x10] sm:$0xff] %v1435_v0  ;;  %v1429_v23 = vmul.f32 %v1421_v48, %v1381_v8  ;;  %v1415_v17 = vmul.f32 0.5, %v1884_v56 }
 0x2ab   : > { %1444 = vst [vmem:[%s2551_s11 + $0x18] sm:$0xff] %v1436_v37  ;;  %v1430_v36 = vmul.f32 %v1422_v15, %v1382_v13  ;;  %v1416_v19 = vmul.f32 0.5, %v1886_v16 }
 0x2ac   : > { %v1437_v22 = vadd.f32 %v1890_v10, %v1429_v23  ;;  %v1423_v25 = vadd.f32 0.5, %v1415_v17 }
 0x2ad   : > { %v1438_v27 = vadd.f32 %v1891_v18, %v1430_v36  ;;  %v1424_v29 = vadd.f32 0.5, %v1416_v19 }
 0x2ae   : > { %1445 = vst [vmem:[%s2551_s11 + $0x20] sm:$0xff] %v1437_v22  ;;  %v1431_v30 = vmul.f32 %v1423_v25, %v1383_v21 }
 0x2af   : > { %1446 = vst [vmem:[%s2551_s11 + $0x28] sm:$0xff] %v1438_v27  ;;  %v1432_v28 = vmul.f32 %v1424_v29, %v1384_v26 }
 0x2b0   : > { %v1439_v2 = vadd.f32 %v1892_v43, %v1431_v30 }
 0x2b1   : > { %v1440_v20 = vadd.f32 %v1893_v11, %v1432_v28 }
 0x2b2   : > { %1447 = vst [vmem:[%s2551_s11 + $0x30] sm:$0xff] %v1439_v2 }
 0x2b3   : > { %1448 = vst [vmem:[%s2551_s11 + $0x38] sm:$0xff] %v1440_v20 }
 0x2b4   : > { %1935 = shalt.err (!%p1932_p6)
}
 0x2b5   : > { %s1936_s18 = scalar_lea.hbm %s2573_s27, 1024  ;;  %s1940_s15 = scalar_lea.hbm %s2634_s6, 2048 }
 0x2b6   : > { %p1937_p7 = scmp.ne.s32.totalorder %s2573_s27, %s1936_s18  ;;  %p1941_p0 = scmp.lt.u32.totalorder %s2573_s27, %s2634_s6 }
 0x2b7   : > { %p1942_p2 = scmp.lt.u32.totalorder %s1940_s15, %s1936_s18  ;;  %p1944_p8 = scmp.lt.u32.totalorder %s1936_s18, %s2573_s27 }
 0x2b8   : > { %p1938_p9 = pnand %p1937_p7, %p2646_p10 }
 0x2b9   : > { %p1943_p4 = por %p1942_p2, %p1941_p0 }
 0x2ba   : > { %p1939_p12 = pneg %p1938_p9 }
 0x2bb   : > { %p1945_p11 = por %p1944_p8, %p1943_p4 }
 0x2bd   : > { %p1946_p13 = pnand %p1945_p11, %p1939_p12 }
 0x2bf   : > { %1949 = shalt.err (!%p1946_p13)
}
 0x2c0   : > { %s2012_s19 = smov 256   ;;  %s2013_s20 = smov 16  }
 0x2c1   : > { %1753 = dma.vmem_to_hbm [thread:$0]  (%p2646_p10), %s2575_s12, 1024, %s2573_s27, %s2582_s24, %s2012_s19, %s2012_s19, %s2013_s20  }
 0x2c2 PF: > { %p1765_p1 = scmp.ge.s32.totalorder %s2004_s26, 2  ;;  %s1480_s28 = sand.u32 1, %s1984_s21  }
 0x2c3   : > { %p2647_p3 = scmp.ne.s32.totalorder %s2640_s9, 0  ;;  %s1481_s30 = scalar_lea.sflag [#allocation4], %s1480_s28 }
 0x2c5   : > { %p1760_p5 = pnand %p1765_p1, %p2647_p3 }
 0x2c7   : > { %1979 = dma.done.wait (!%p1760_p5), %s1481_s30, 1024  }
 0x2c8   : > { %1981 = vsyncadd (!%p1760_p5), %s1481_s30, 4294966272  ;;  %s20_s26 = sadd.s32 1, %s2004_s26   ;;  %s2648_s21 = smov %s1988_s22 }
 0x2c9   : > { %p17_p6 = scmp.ge.s32.totalorder %s20_s26, 4   ;;  %s2649_s22 = smov %s1992_s23 }
 0x2ca   : > { %s2650_s23 = smov %s2102_s10  ;;  %s2651_s24 = smov %s2000_s25 }
 0x2cb   : > { %s2652_s25 = smov %s2654_s29  ;;  %19 = sbr.rel (!%p17_p6) target bundleno = 5 (0x5), region = 92 }
 0x2d2   :  { %1486 = vsyncpa [#allocation3], 1 }
 0x2d3   :  { %1488 = vsyncpa [#allocation3 + $0x1], 1 }
 0x2d4   :  { %1489 = vsyncpa [#allocation4], 1 }
 0x2d5   :  { %1491 = vsyncpa [#allocation4 + $0x1], 1 }

</bundles_post_ra>
